<compile_context>
chip_gen: v7x
topology: tpu7x:2x2x1
jax: 0.10.0
libtpu: 0.0.40
codegen_flags: <defaults>
</compile_context>

<pallas_src>
import jax
import jax.numpy as jnp
from jax.experimental import pallas as pl
from jax.experimental.pallas import tpu as pltpu

B, N, F, FP, HID, L = 2, 16, 16, 128, 128, 2   # batch, nodes, node-feat, fingerprint, hidden, layers
BN = B * N
OUT_PAD = 128                                  # lane-dense padded output width


def ngf_head_kernel(a_ref, x_ref, s_ref,
                    wl_ref, bl_ref, wfp_ref, bfp_ref,
                    wh1_ref, bh1_ref, wh2t_ref, bh2_ref,
                    out_ref):
    A = a_ref[...]                            # [BN, BN] block-diagonal adjacency
    h = x_ref[...]                            # [BN, F]  flat node features
    S = s_ref[...]                            # [B, BN]  segment-sum matrix (ones per graph)
    fp = jnp.zeros((B, FP), jnp.float32)

    for l in range(L):                        # static unroll over NGF layers
        # message passing: one flat (BN,BN)@(BN,F) matmul, no batched einsum / reshapes
        msg = jnp.dot(A, h, preferred_element_type=jnp.float32)             # [BN, F]
        h = jnp.maximum(
            jnp.dot(msg, wl_ref[l], preferred_element_type=jnp.float32) + bl_ref[l],
            0.0)                                                             # [BN, F]
        logits = (jnp.dot(h, wfp_ref[l], preferred_element_type=jnp.float32)
                  + bfp_ref[l])                                              # [BN, FP]

        # row-wise softmax (max-stabilized, exact reciprocal: kernel is not VPU-bound)
        m = jnp.max(logits, axis=-1, keepdims=True)
        e = jnp.exp(logits - m)
        p = e / jnp.sum(e, axis=-1, keepdims=True)                           # [BN, FP]

        # per-graph node sum as an MXU segment-sum (stays 2-D and lane-dense)
        fp = fp + jnp.dot(S, p, preferred_element_type=jnp.float32)          # [B, FP]

    # regression head, whole batch at once
    hid = jnp.maximum(
        jnp.dot(fp, wh1_ref[...], preferred_element_type=jnp.float32) + bh1_ref[...],
        0.0)                                                                 # [B, HID]
    # final (HID -> 1) projection: VPU multiply + lane reduce (avoids a 1-lane MXU result)
    y = jnp.sum(hid * wh2t_ref[...], axis=-1, keepdims=True) + bh2_ref[...]  # [B, 1]

    # lane-dense unmasked store: broadcast per-graph scalar across 128 lanes; wrapper keeps lane 0
    out_ref[...] = jnp.broadcast_to(y, (B, OUT_PAD))


def ngf_with_head(adj, x, params):
    wl, bl, wfp, bfp, wh1, bh1, wh2, bh2 = params

    # Layout plumbing done once in the wrapper (plain XLA ops, not in the kernel):
    # block-diagonal adjacency, flat features, segment-sum matrix, transposed head weight.
    a_blk = (jnp.eye(B, dtype=adj.dtype)[:, None, :, None]
             * adj[:, :, None, :]).reshape(BN, BN)                 # [BN, BN]
    x_flat = x.reshape(BN, F)                                      # [BN, F]
    seg = jnp.repeat(jnp.eye(B, dtype=jnp.float32), N, axis=1)     # [B, BN]
    wh2_t = wh2.T                                                  # [1, HID]

    flops = 2 * (L * (BN * BN * F + BN * F * F + BN * F * FP + B * BN * FP)
                 + B * FP * HID + B * HID)
    bytes_accessed = 4 * (a_blk.size + x_flat.size + seg.size
                          + wl.size + bl.size + wfp.size + bfp.size
                          + wh1.size + bh1.size + wh2_t.size + bh2.size
                          + B * OUT_PAD)

    vmem = pl.BlockSpec(memory_space=pltpu.MemorySpace.VMEM)       # whole-array, VMEM-resident
    out = pl.pallas_call(
        ngf_head_kernel,
        out_shape=jax.ShapeDtypeStruct((B, OUT_PAD), jnp.float32),
        in_specs=[vmem] * 11,
        out_specs=vmem,
        cost_estimate=pl.CostEstimate(
            flops=flops,
            transcendentals=L * BN * FP,
            bytes_accessed=bytes_accessed),
    )(a_blk, x_flat, seg, wl, bl, wfp, bfp, wh1, bh1, wh2_t, bh2)
    return out[:, :1]                                              # [B, 1]


def reference(adj, x, params):
    """Pure-JAX mirror of the PyTorch semantics for validation."""
    wl, bl, wfp, bfp, wh1, bh1, wh2, bh2 = params

    def one(A, h0):
        h = h0
        fp = jnp.zeros((1, FP), jnp.float32)
        for l in range(L):
            h = jax.nn.relu((A @ h) @ wl[l] + bl[l])
            fp = fp + jax.nn.softmax(h @ wfp[l] + bfp[l], axis=-1).sum(0, keepdims=True)
        hid = jax.nn.relu(fp @ wh1 + bh1)
        return (hid @ wh2 + bh2)[0]

    return jax.vmap(one)(adj, x)


if __name__ == "__main__":
    key = jax.random.PRNGKey(0)
    ks = jax.random.split(key, 10)
    scale = 0.1

    # deterministic synthetic parameters (shapes implied by the module's __init__)
    wl  = scale * jax.random.normal(ks[0], (L, F, F), jnp.float32)
    bl  = scale * jax.random.normal(ks[1], (L, 1, F), jnp.float32)
    wfp = scale * jax.random.normal(ks[2], (L, F, FP), jnp.float32)
    bfp = scale * jax.random.normal(ks[3], (L, 1, FP), jnp.float32)
    wh1 = scale * jax.random.normal(ks[4], (FP, HID), jnp.float32)
    bh1 = scale * jax.random.normal(ks[5], (1, HID), jnp.float32)
    wh2 = scale * jax.random.normal(ks[6], (HID, 1), jnp.float32)
    bh2 = scale * jax.random.normal(ks[7], (1, 1), jnp.float32)
    params = (wl, bl, wfp, bfp, wh1, bh1, wh2, bh2)

    # deterministic synthetic graph batch
    x = jax.random.normal(ks[8], (B, N, F), jnp.float32)
    a = jax.random.bernoulli(ks[9], 0.3, (B, N, N)).astype(jnp.float32)
    adj = jnp.clip(a + jnp.transpose(a, (0, 2, 1)) + jnp.eye(N, dtype=jnp.float32)[None], 0.0, 1.0)

    y = ngf_with_head(adj, x, params)
    jax.block_until_ready(y)

    y_ref = reference(adj, x, params)
    assert y.shape == (B, 1)
    assert jnp.allclose(y, y_ref, rtol=1e-4, atol=1e-4), (y, y_ref)

    print("KERNEL_OK")
</pallas_src>

<mosaic_0001>
module attributes {stable_mosaic.version = 11 : i64} {
  func.func @ngf_head_kernel(%arg0: memref<32x32xf32, #tpu.memory_space<vmem>>, %arg1: memref<32x16xf32, #tpu.memory_space<vmem>>, %arg2: memref<2x32xf32, #tpu.memory_space<vmem>>, %arg3: memref<2x16x16xf32, #tpu.memory_space<vmem>>, %arg4: memref<2x1x16xf32, #tpu.memory_space<vmem>>, %arg5: memref<2x16x128xf32, #tpu.memory_space<vmem>>, %arg6: memref<2x1x128xf32, #tpu.memory_space<vmem>>, %arg7: memref<128x128xf32, #tpu.memory_space<vmem>>, %arg8: memref<1x128xf32, #tpu.memory_space<vmem>>, %arg9: memref<1x128xf32, #tpu.memory_space<vmem>>, %arg10: memref<1x1xf32, #tpu.memory_space<vmem>>, %arg11: memref<2x128xf32, #tpu.memory_space<vmem>>) attributes {dimension_semantics = [], scalar_prefetch = 0 : i64, scratch_operands = 0 : i64, tpu.core_type = #tpu.core_type<tc>} {
    %c0 = arith.constant 0 : index
    %c0_0 = arith.constant 0 : index
    %0 = vector.load %arg0[%c0, %c0_0] : memref<32x32xf32, #tpu.memory_space<vmem>>, vector<32x32xf32>
    %c0_1 = arith.constant 0 : index
    %c0_2 = arith.constant 0 : index
    %1 = vector.load %arg1[%c0_1, %c0_2] : memref<32x16xf32, #tpu.memory_space<vmem>>, vector<32x16xf32>
    %c0_3 = arith.constant 0 : index
    %c0_4 = arith.constant 0 : index
    %2 = vector.load %arg2[%c0_3, %c0_4] : memref<2x32xf32, #tpu.memory_space<vmem>>, vector<2x32xf32>
    %cst = arith.constant 0.000000e+00 : f32
    %3 = vector.broadcast %cst : f32 to vector<2x128xf32>
    %cst_5 = arith.constant dense<0.000000e+00> : vector<32x16xf32>
    %4 = tpu.matmul %0, %1, %cst_5 {dimension_numbers = #tpu.dot_dimension_numbers<[1], [0], [0], [1], [0, 0, 1, 1], [], []>} : vector<32x32xf32>, vector<32x16xf32>, vector<32x16xf32> -> vector<32x16xf32>
    %c0_6 = arith.constant 0 : index
    %c0_7 = arith.constant 0 : index
    %c0_8 = arith.constant 0 : index
    %5 = vector.load %arg3[%c0_6, %c0_7, %c0_8] : memref<2x16x16xf32, #tpu.memory_space<vmem>>, vector<1x16x16xf32>
    %6 = vector.shape_cast %5 : vector<1x16x16xf32> to vector<16x16xf32>
    %cst_9 = arith.constant dense<0.000000e+00> : vector<32x16xf32>
    %7 = tpu.matmul %4, %6, %cst_9 {dimension_numbers = #tpu.dot_dimension_numbers<[1], [0], [0], [1], [0, 0, 1, 1], [], []>} : vector<32x16xf32>, vector<16x16xf32>, vector<32x16xf32> -> vector<32x16xf32>
    %c0_10 = arith.constant 0 : index
    %c0_11 = arith.constant 0 : index
    %c0_12 = arith.constant 0 : index
    %8 = vector.load %arg4[%c0_10, %c0_11, %c0_12] : memref<2x1x16xf32, #tpu.memory_space<vmem>>, vector<1x1x16xf32>
    %9 = vector.shape_cast %8 : vector<1x1x16xf32> to vector<1x16xf32>
    %10 = vector.broadcast %9 : vector<1x16xf32> to vector<32x16xf32>
    %11 = arith.addf %7, %10 : vector<32x16xf32>
    %cst_13 = arith.constant 0.000000e+00 : f32
    %12 = vector.broadcast %cst_13 : f32 to vector<32x16xf32>
    %13 = arith.maximumf %11, %12 : vector<32x16xf32>
    %c0_14 = arith.constant 0 : index
    %c0_15 = arith.constant 0 : index
    %c0_16 = arith.constant 0 : index
    %14 = vector.load %arg5[%c0_14, %c0_15, %c0_16] : memref<2x16x128xf32, #tpu.memory_space<vmem>>, vector<1x16x128xf32>
    %15 = vector.shape_cast %14 : vector<1x16x128xf32> to vector<16x128xf32>
    %cst_17 = arith.constant dense<0.000000e+00> : vector<32x128xf32>
    %16 = tpu.matmul %13, %15, %cst_17 {dimension_numbers = #tpu.dot_dimension_numbers<[1], [0], [0], [1], [0, 0, 1, 1], [], []>} : vector<32x16xf32>, vector<16x128xf32>, vector<32x128xf32> -> vector<32x128xf32>
    %c0_18 = arith.constant 0 : index
    %c0_19 = arith.constant 0 : index
    %c0_20 = arith.constant 0 : index
    %17 = vector.load %arg6[%c0_18, %c0_19, %c0_20] : memref<2x1x128xf32, #tpu.memory_space<vmem>>, vector<1x1x128xf32>
    %18 = vector.shape_cast %17 : vector<1x1x128xf32> to vector<1x128xf32>
    %19 = vector.broadcast %18 : vector<1x128xf32> to vector<32x128xf32>
    %20 = arith.addf %16, %19 : vector<32x128xf32>
    %cst_21 = arith.constant dense<0xFF800000> : vector<32xf32>
    %21 = vector.multi_reduction <maximumf>, %20, %cst_21 [1] : vector<32x128xf32> to vector<32xf32>
    %22 = vector.shape_cast %21 : vector<32xf32> to vector<32x1xf32>
    %23 = vector.broadcast %22 : vector<32x1xf32> to vector<32x128xf32>
    %24 = arith.subf %20, %23 : vector<32x128xf32>
    %25 = math.exp %24 : vector<32x128xf32>
    %cst_22 = arith.constant dense<0.000000e+00> : vector<32xf32>
    %26 = vector.multi_reduction <add>, %25, %cst_22 [1] : vector<32x128xf32> to vector<32xf32>
    %27 = vector.shape_cast %26 : vector<32xf32> to vector<32x1xf32>
    %28 = vector.broadcast %27 : vector<32x1xf32> to vector<32x128xf32>
    %29 = arith.divf %25, %28 : vector<32x128xf32>
    %cst_23 = arith.constant dense<0.000000e+00> : vector<2x128xf32>
    %30 = tpu.matmul %2, %29, %cst_23 {dimension_numbers = #tpu.dot_dimension_numbers<[1], [0], [0], [1], [0, 0, 1, 1], [], []>} : vector<2x32xf32>, vector<32x128xf32>, vector<2x128xf32> -> vector<2x128xf32>
    %31 = arith.addf %3, %30 : vector<2x128xf32>
    %cst_24 = arith.constant dense<0.000000e+00> : vector<32x16xf32>
    %32 = tpu.matmul %0, %13, %cst_24 {dimension_numbers = #tpu.dot_dimension_numbers<[1], [0], [0], [1], [0, 0, 1, 1], [], []>} : vector<32x32xf32>, vector<32x16xf32>, vector<32x16xf32> -> vector<32x16xf32>
    %c1 = arith.constant 1 : index
    %c0_25 = arith.constant 0 : index
    %c0_26 = arith.constant 0 : index
    %33 = vector.load %arg3[%c1, %c0_25, %c0_26] : memref<2x16x16xf32, #tpu.memory_space<vmem>>, vector<1x16x16xf32>
    %34 = vector.shape_cast %33 : vector<1x16x16xf32> to vector<16x16xf32>
    %cst_27 = arith.constant dense<0.000000e+00> : vector<32x16xf32>
    %35 = tpu.matmul %32, %34, %cst_27 {dimension_numbers = #tpu.dot_dimension_numbers<[1], [0], [0], [1], [0, 0, 1, 1], [], []>} : vector<32x16xf32>, vector<16x16xf32>, vector<32x16xf32> -> vector<32x16xf32>
    %c1_28 = arith.constant 1 : index
    %c0_29 = arith.constant 0 : index
    %c0_30 = arith.constant 0 : index
    %36 = vector.load %arg4[%c1_28, %c0_29, %c0_30] : memref<2x1x16xf32, #tpu.memory_space<vmem>>, vector<1x1x16xf32>
    %37 = vector.shape_cast %36 : vector<1x1x16xf32> to vector<1x16xf32>
    %38 = vector.broadcast %37 : vector<1x16xf32> to vector<32x16xf32>
    %39 = arith.addf %35, %38 : vector<32x16xf32>
    %cst_31 = arith.constant 0.000000e+00 : f32
    %40 = vector.broadcast %cst_31 : f32 to vector<32x16xf32>
    %41 = arith.maximumf %39, %40 : vector<32x16xf32>
    %c1_32 = arith.constant 1 : index
    %c0_33 = arith.constant 0 : index
    %c0_34 = arith.constant 0 : index
    %42 = vector.load %arg5[%c1_32, %c0_33, %c0_34] : memref<2x16x128xf32, #tpu.memory_space<vmem>>, vector<1x16x128xf32>
    %43 = vector.shape_cast %42 : vector<1x16x128xf32> to vector<16x128xf32>
    %cst_35 = arith.constant dense<0.000000e+00> : vector<32x128xf32>
    %44 = tpu.matmul %41, %43, %cst_35 {dimension_numbers = #tpu.dot_dimension_numbers<[1], [0], [0], [1], [0, 0, 1, 1], [], []>} : vector<32x16xf32>, vector<16x128xf32>, vector<32x128xf32> -> vector<32x128xf32>
    %c1_36 = arith.constant 1 : index
    %c0_37 = arith.constant 0 : index
    %c0_38 = arith.constant 0 : index
    %45 = vector.load %arg6[%c1_36, %c0_37, %c0_38] : memref<2x1x128xf32, #tpu.memory_space<vmem>>, vector<1x1x128xf32>
    %46 = vector.shape_cast %45 : vector<1x1x128xf32> to vector<1x128xf32>
    %47 = vector.broadcast %46 : vector<1x128xf32> to vector<32x128xf32>
    %48 = arith.addf %44, %47 : vector<32x128xf32>
    %cst_39 = arith.constant dense<0xFF800000> : vector<32xf32>
    %49 = vector.multi_reduction <maximumf>, %48, %cst_39 [1] : vector<32x128xf32> to vector<32xf32>
    %50 = vector.shape_cast %49 : vector<32xf32> to vector<32x1xf32>
    %51 = vector.broadcast %50 : vector<32x1xf32> to vector<32x128xf32>
    %52 = arith.subf %48, %51 : vector<32x128xf32>
    %53 = math.exp %52 : vector<32x128xf32>
    %cst_40 = arith.constant dense<0.000000e+00> : vector<32xf32>
    %54 = vector.multi_reduction <add>, %53, %cst_40 [1] : vector<32x128xf32> to vector<32xf32>
    %55 = vector.shape_cast %54 : vector<32xf32> to vector<32x1xf32>
    %56 = vector.broadcast %55 : vector<32x1xf32> to vector<32x128xf32>
    %57 = arith.divf %53, %56 : vector<32x128xf32>
    %cst_41 = arith.constant dense<0.000000e+00> : vector<2x128xf32>
    %58 = tpu.matmul %2, %57, %cst_41 {dimension_numbers = #tpu.dot_dimension_numbers<[1], [0], [0], [1], [0, 0, 1, 1], [], []>} : vector<2x32xf32>, vector<32x128xf32>, vector<2x128xf32> -> vector<2x128xf32>
    %59 = arith.addf %31, %58 : vector<2x128xf32>
    %c0_42 = arith.constant 0 : index
    %c0_43 = arith.constant 0 : index
    %60 = vector.load %arg7[%c0_42, %c0_43] : memref<128x128xf32, #tpu.memory_space<vmem>>, vector<128x128xf32>
    %cst_44 = arith.constant dense<0.000000e+00> : vector<2x128xf32>
    %61 = tpu.matmul %59, %60, %cst_44 {dimension_numbers = #tpu.dot_dimension_numbers<[1], [0], [0], [1], [0, 0, 1, 1], [], []>} : vector<2x128xf32>, vector<128x128xf32>, vector<2x128xf32> -> vector<2x128xf32>
    %c0_45 = arith.constant 0 : index
    %c0_46 = arith.constant 0 : index
    %62 = vector.load %arg8[%c0_45, %c0_46] : memref<1x128xf32, #tpu.memory_space<vmem>>, vector<1x128xf32>
    %63 = vector.broadcast %62 : vector<1x128xf32> to vector<2x128xf32>
    %64 = arith.addf %61, %63 : vector<2x128xf32>
    %cst_47 = arith.constant 0.000000e+00 : f32
    %65 = vector.broadcast %cst_47 : f32 to vector<2x128xf32>
    %66 = arith.maximumf %64, %65 : vector<2x128xf32>
    %c0_48 = arith.constant 0 : index
    %c0_49 = arith.constant 0 : index
    %67 = vector.load %arg9[%c0_48, %c0_49] : memref<1x128xf32, #tpu.memory_space<vmem>>, vector<1x128xf32>
    %68 = vector.broadcast %67 : vector<1x128xf32> to vector<2x128xf32>
    %69 = arith.mulf %66, %68 : vector<2x128xf32>
    %cst_50 = arith.constant dense<0.000000e+00> : vector<2xf32>
    %70 = vector.multi_reduction <add>, %69, %cst_50 [1] : vector<2x128xf32> to vector<2xf32>
    %71 = vector.shape_cast %70 : vector<2xf32> to vector<2x1xf32>
    %c0_51 = arith.constant 0 : index
    %c0_52 = arith.constant 0 : index
    %72 = vector.load %arg10[%c0_51, %c0_52] : memref<1x1xf32, #tpu.memory_space<vmem>>, vector<1x1xf32>
    %73 = vector.broadcast %72 : vector<1x1xf32> to vector<2x1xf32>
    %74 = arith.addf %71, %73 : vector<2x1xf32>
    %75 = vector.shape_cast %74 : vector<2x1xf32> to vector<2x1xf32>
    %76 = vector.broadcast %75 : vector<2x1xf32> to vector<2x128xf32>
    %c0_53 = arith.constant 0 : index
    %c0_54 = arith.constant 0 : index
    %77 = vector.load %arg11[%c0_53, %c0_54] : memref<2x128xf32, #tpu.memory_space<vmem>>, vector<2x128xf32>
    tpu.vector_store %arg11[%c0_53, %c0_54], %76 {strides = array<i32>} : memref<2x128xf32, #tpu.memory_space<vmem>>, vector<2x128xf32>,
    return
  }
}

</mosaic_0001>

<bundles_post_ra>
// kernel: tpu_custom_call.1
= control target key start
LH: loop header
LB: loop body
LE: loop exit
PB: predicated region body
PF: predicated region fallthrough
CT: control target
= control target key end

     0   :  { %s1750_s0 = inlined_call_operand.vmem [shape: f32[32,32], index: 0, kind: input, shape index: {}]   ;;  %s1751_s1 = inlined_call_operand.vmem [shape: f32[32,16], index: 1, kind: input, shape index: {}]   ;;  %s1752_s2 = inlined_call_operand.vmem [shape: f32[2,32], index: 2, kind: input, shape index: {}]   ;;  %s1753_s3 = inlined_call_operand.hbm [shape: f32[2,16,16], index: 3, kind: input, shape index: {}]   ;;  %s1754_s4 = inlined_call_operand.hbm [shape: f32[2,1,16], index: 4, kind: input, shape index: {}]   ;;  %s1755_s5 = inlined_call_operand.vmem [shape: f32[2,16,128], index: 5, kind: input, shape index: {}]   ;;  %s1756_s6 = inlined_call_operand.vmem [shape: f32[2,1,128], index: 6, kind: input, shape index: {}]   ;;  %s1757_s7 = inlined_call_operand.hbm [shape: f32[128,128], index: 7, kind: input, shape index: {}]   ;;  %s1758_s8 = inlined_call_operand.vmem [shape: f32[1,128], index: 8, kind: input, shape index: {}]   ;;  %s1759_s9 = inlined_call_operand.vmem [shape: f32[1,128], index: 9, kind: input, shape index: {}]   ;;  %s1760_s10 = inlined_call_operand.<no memory space> [shape: f32[1,1], index: 10, kind: input, shape index: {}]   ;;  %s1761_s11 = inlined_call_operand.hbm [shape: f32[2,128], index: 11, kind: output, shape index: {}]  }
   0x1   :  { %v16_v0 = vstv %s1760_s10 }
   0x2   :  { %17 = vst [vmem:[#allocation2] sm:$0x1] %v16_v0 }
   0x3   :  { %18 = vsyncpa [#allocation4], 0 }
   0x4   :  { %19 = vsyncpa [#allocation7], 0 }
   0x5   :  { %20 = vsyncpa [#allocation5], 0  ;;  %s1500_s19 = smov [#allocation6]   ;;  %s1406_s23 = scalar_lea.hbm %s1754_s4, 32 }
   0x6   :  { %s44_s20 = sshll.u32 %s1500_s19, 4  ;;  %p1407_p0 = scmp.ne.s32.totalorder %s1754_s4, %s1406_s23  ;;  %s45_s20 = int_to_ptr.vmem [resolvable:$true] %s44_s20 }
   0x7   :  { %p1410_p1 = scmp.lt.u32.totalorder %s1406_s23, %s1754_s4 }
   0x9   :  { %p1412_p2 = pnand %p1410_p1, %p1407_p0 }
   0xb   :  { %1415 = shalt.err (!%p1412_p2)
}
   0xc   :  { %s1416_s10 = scalar_lea.vmem %s45_s20, 32  ;;  %p1421_p4 = scmp.lt.s32.totalorder %s45_s20, %s45_s20 }
   0xd   :  { %p1417_p3 = scmp.ne.s32.totalorder %s45_s20, %s1416_s10  ;;  %p1422_p5 = scmp.lt.s32.totalorder %s1416_s10, %s1416_s10 }
   0xf   :  { %p1423_p6 = por %p1422_p5, %p1421_p4 }
  0x11   :  { %p1424_p7 = pnand %p1423_p6, %p1417_p3 }
  0x13   :  { %1427 = shalt.err (!%p1424_p7)
}
  0x14   :  { %s1501_s28 = smov 16   ;;  %s1502_s29 = smov 1  }
  0x15   :  { %50 = dma.hbm_to_vmem [thread:$0]  %s1754_s4, 32, %s45_s20, [#allocation7], %s1501_s28, %s1501_s28, %s1502_s29  }
  0x16   :  { %s1503_s13 = smov [#allocation3]   ;;  %s1428_s17 = scalar_lea.hbm %s1753_s3, 512 }
  0x17   :  { %s32_s14 = sshll.u32 %s1503_s13, 4  ;;  %p1429_p8 = scmp.ne.s32.totalorder %s1753_s3, %s1428_s17  ;;  %s33_s14 = int_to_ptr.vmem [resolvable:$true] %s32_s14 }
  0x18   :  { %p1432_p9 = scmp.lt.u32.totalorder %s1428_s17, %s1753_s3 }
  0x1a   :  { %p1434_p10 = pnand %p1432_p9, %p1429_p8 }
  0x1c   :  { %1437 = shalt.err (!%p1434_p10)
}
  0x1d   :  { %s1438_s23 = scalar_lea.vmem %s33_s14, 512  ;;  %p1443_p12 = scmp.lt.s32.totalorder %s33_s14, %s33_s14 }
  0x1e   :  { %p1439_p11 = scmp.ne.s32.totalorder %s33_s14, %s1438_s23  ;;  %p1444_p13 = scmp.lt.s32.totalorder %s1438_s23, %s1438_s23 }
  0x20   :  { %p1445_p0 = por %p1444_p13, %p1443_p12 }
  0x22   :  { %p1446_p1 = pnand %p1445_p0, %p1439_p11 }
  0x24   :  { %1449 = shalt.err (!%p1446_p1)
}
  0x25   :  { %s1504_s4 = smov 128   ;;  %s1505_s20 = smov 8  }
  0x26   :  { %38 = dma.hbm_to_vmem [thread:$0]  %s1753_s3, 512, %s33_s14, [#allocation4], %s1504_s4, %s1504_s4, %s1505_s20  }
  0x27   :  { %s1506_s26 = smov [#allocation8]   ;;  %s1450_s29 = scalar_lea.hbm %s1757_s7, 2048 }
  0x28   :  { %s60_s27 = sshll.u32 %s1506_s26, 4  ;;  %p1451_p2 = scmp.ne.s32.totalorder %s1757_s7, %s1450_s29  ;;  %s61_s27 = int_to_ptr.vmem [resolvable:$true] %s60_s27 }
  0x29   :  { %p1454_p3 = scmp.lt.u32.totalorder %s1450_s29, %s1757_s7 }
  0x2b   :  { %p1456_p4 = pnand %p1454_p3, %p1451_p2 }
  0x2d   :  { %1459 = shalt.err (!%p1456_p4)
}
  0x2e   :  { %s1460_s16 = scalar_lea.vmem %s61_s27, 2048  ;;  %p1465_p6 = scmp.lt.s32.totalorder %s61_s27, %s61_s27 }
  0x2f   :  { %p1461_p5 = scmp.ne.s32.totalorder %s61_s27, %s1460_s16  ;;  %p1466_p7 = scmp.lt.s32.totalorder %s1460_s16, %s1460_s16 }
  0x31   :  { %p1467_p8 = por %p1466_p7, %p1465_p6 }
  0x33   :  { %p1468_p9 = pnand %p1467_p8, %p1461_p5 }
  0x35   :  { %1471 = shalt.err (!%p1468_p9)
}
  0x36   :  { %66 = dma.hbm_to_vmem [thread:$0]  %s1757_s7, 2048, %s61_s27, [#allocation7], %s1504_s4, %s1504_s4, %s1505_s20  }
  0x37   :  { %1494 = dma.done.wait [#allocation4], 512  }
  0x38   :  { %1495 = vsyncadd [#allocation4], 4294966784 }
  0x39   :  { %1496 = dma.done.wait [#allocation7], 2080  }
  0x3a   :  { %1497 = vsyncadd [#allocation7], 4294965216  ;;  %vm91_vm0 = vcmask 261120   ;;  %v86_v1 = vld [vmem:[%s1751_s1] sm:$0xff]  ;;  %v87_v2 = vld [vmem:[%s1751_s1 + $0x8] sm:$0xff]  ;;  %vm198_vm1 = vcmask 130048  }
  0x3b   :  { %v88_v3 = vld [vmem:[%s1751_s1 + $0x10] sm:$0xff]  ;;  %v1290_v4 = vpack.c.bf16 %v87_v2, %v86_v1  ;;  %v89_v5 = vld [vmem:[%s1751_s1 + $0x18] sm:$0xff]  ;;  %v82_v6 = vld [vmem:[%s1750_s0] sm:$0xff]  ;;  %vm1508_vm2 = vmmov 0   ;;  %vm1028_vm3 = vcmask 1041408  }
  0x3c   :  { %v1294_v7 = vpack.c.bf16 %v89_v5, %v88_v3  ;;  %1173 = vmatprep.mubr.msk.f32.mxu1 %vm91_vm0, %v82_v6  ;;  %v189_v8 = vld [vmem:[#allocation3] sm:$0xff]  ;;  %1207 = vmatprep.mubr.msk.f32.mxu0 %vm91_vm0, %v82_v6  ;;  %v190_v9 = vld [vmem:[#allocation3 + $0x8] sm:$0xff]  ;;  %v85_v13 = vld [vmem:[%s1750_s0 + $0x18] sm:$0xff] }
  0x3d   :  { %1291 = vmatprep.subr.bf16.mxu1 %v1290_v4  ;;  %v1298_v10 = vpack.c.bf16 %v190_v9, %v189_v8  ;;  %v83_v11 = vld [vmem:[%s1750_s0 + $0x8] sm:$0xff]  ;;  %v84_v12 = vld [vmem:[%s1750_s0 + $0x10] sm:$0xff]  ;;  %v300_v18 = vld [vmem:[%s1755_s5] sm:$0xff] }
  0x3e   :  { %1293 = vmatpush3.bf16.msra.mxu1 %v1290_v4  ;;  %v301_v19 = vld [vmem:[%s1755_s5 + $0x8] sm:$0xff]  ;;  %v1066_v21 = vld [vmem:[#allocation6] ss:$0 sm:$0xff]  ;;  %v528_v36 = vld [vmem:[#allocation3 + $0x10] sm:$0xff] }
  0x3f   :  { %1295 = vmatprep.subr.bf16.mxu1 %v1294_v7  ;;  %v1302_v20 = vpack.c.bf16 %v301_v19, %v300_v18  ;;  %v529_v37 = vld [vmem:[#allocation3 + $0x18] sm:$0xff]  ;;  %v1085_v39 = vld [vmem:[%s1755_s5 + $0x10] sm:$0xff]  ;;  %v1080_v50 = vld [vmem:[#allocation6 + $0x1] ss:$0 sm:$0xff] }
  0x40   :  { %v1314_v38 = vpack.c.bf16 %v529_v37, %v528_v36  ;;  %v1086_v40 = vld [vmem:[%s1755_s5 + $0x18] sm:$0xff]  ;;  %v1088_v63 = vld [vmem:[%s1756_s6 + $0x1] ss:$0 sm:$0xff] }
  0x41   :  { %v1318_v41 = vpack.c.bf16 %v1086_v40, %v1085_v39 }
  0x42   :  { %1297 = vmatpush3.bf16.msra.mxu1 %v1294_v7  ;;  %v1071_v7 = vld [vmem:[%s1756_s6] ss:$0 sm:$0xff] }
  0x43   :  { %1299 = vmatprep.subr.bf16.mxu1 %v1298_v10 }
  0x45   :  { %1174 = vmatmul.mubr.msk.f32.vlgmr.msra.gmra.mrb[0].mxu1 %vm91_vm0, %v83_v11 }
  0x46   :  { %1176 = vmatprep.mubr.msk.f32.mxu1 %vm91_vm0, %v84_v12  ;;  %1301 = vmatpush3.bf16.msra.mxu1 %v1298_v10 }
  0x47   :  { %1303 = vmatprep.subr.bf16.mxu1 %v1302_v20 }
  0x49   :  { %1177 = vmatmul.mubr.msk.f32.gmra.mrb[2].mxu1 %vm91_vm0, %v85_v13 }
 0x118   :  { %v1175_v14 = vpop.f32.mrb[0].mxu1 }
 0x119   :  { %v170_v15 = vpop.f32.mrb[1].mxu1 }
 0x11a   :  { %1183 = vmatprep.mubr.msk.f32.mxu1 %vm198_vm1, %v170_v15 }
 0x11b   :  { %1184 = vmatmul.mubr.msk.f32.vlgmr.msra.gmra.mrb[4].mxu1 %vm198_vm1, %v1175_v14 }
 0x11c   :  { %v1178_v16 = vpop.f32.mrb[2].mxu1  ;;  %1305 = vmatpush3.bf16.msra.mxu1 %v1302_v20 }
 0x11d   :  { %v180_v17 = vpop.f32.mrb[3].mxu1  ;;  %1315 = vmatprep.subr.bf16.mxu1 %v1314_v38 }
 0x11e   :  { %1186 = vmatprep.mubr.msk.f32.mxu1 %vm198_vm1, %v180_v17 }
 0x11f   :  { %1187 = vmatmul.mubr.msk.f32.gmra.mrb[6].mxu1 %vm198_vm1, %v1178_v16 }
 0x1ee   :  { %v1185_v22 = vpop.f32.mrb[4].mxu1 }
 0x1ef   :  { %v283_v23 = vadd.f32 %v1185_v22, %v1066_v21  ;;  %v277_v24 = vpop.f32.mrb[5].mxu1 }
 0x1f0   :  { %v278_v25 = vadd.f32 %v1066_v21, %v277_v24 }
 0x1f1   :  { %v297_v26 = vmax.f32 %v283_v23, 0.0 }
 0x1f2   :  { %v296_v27 = vmax.f32 %v278_v25, 0.0  ;;  %v1188_v28 = vpop.f32.mrb[6].mxu1 }
 0x1f3   :  { %v293_v29 = vadd.f32 %v1188_v28, %v1066_v21  ;;  %v287_v30 = vpop.f32.mrb[7].mxu1 }
 0x1f4   :  { %v288_v31 = vadd.f32 %v1066_v21, %v287_v30  ;;  %1193 = vmatprep.mubr.msk.f32.mxu1 %vm198_vm1, %v296_v27  ;;  %v1306_v32 = vpack.c.bf16 %v297_v26, %v296_v27 }
 0x1f5   :  { %v299_v33 = vmax.f32 %v293_v29, 0.0  ;;  %1194 = vmatmul.mubr.msk.f32.vlgmr.msra.gmra.mrb[8].mxu1 %vm198_vm1, %v297_v26 }
 0x1f6   :  { %v298_v34 = vmax.f32 %v288_v31, 0.0  ;;  %1307 = vmatprep.subr.bf16.mxu0 %v1306_v32  ;;  %1317 = vmatpush3.bf16.msra.mxu1 %v1314_v38 }
 0x1f7   :  { %1309 = vmatpush3.bf16.msra.mxu0 %v1306_v32 }
 0x1f8   :  { %v1310_v35 = vpack.c.bf16 %v299_v33, %v298_v34  ;;  %1196 = vmatprep.mubr.msk.f32.mxu1 %vm198_vm1, %v298_v34 }
 0x1f9   :  { %1197 = vmatmul.mubr.msk.f32.gmra.mrb[10].mxu1 %vm198_vm1, %v299_v33 }
 0x1fa   :  { %1311 = vmatprep.subr.bf16.mxu0 %v1310_v35 }
 0x1fb   :  { %1313 = vmatpush3.bf16.msra.mxu0 %v1310_v35 }
 0x1fc   :  { %1319 = vmatprep.subr.bf16.mxu0 %v1318_v41 }
 0x1fe   :  { %1208 = vmatmul.mubr.msk.f32.vlgmr.msra.gmra.mrb[0].mxu0 %vm91_vm0, %v83_v11 }
 0x1ff   :  { %1210 = vmatprep.mubr.msk.f32.mxu0 %vm91_vm0, %v84_v12  ;;  %1321 = vmatpush3.bf16.msra.mxu0 %v1318_v41 }
 0x202   :  { %1211 = vmatmul.mubr.msk.f32.gmra.mrb[2].mxu0 %vm91_vm0, %v85_v13 }
 0x2c8   :  { %v1195_v42 = vpop.f32.mrb[8].mxu1 }
 0x2c9   :  { %v387_v43 = vpop.f32.mrb[9].mxu1  ;;  %v393_v10 = vadd.f32 %v1195_v42, %v1071_v7 }
 0x2ca   :  { %v388_v9 = vadd.f32 %v1071_v7, %v387_v43 }
 0x2cc   :  { %v1198_v44 = vpop.f32.mrb[10].mxu1 }
 0x2cd   :  { %v397_v45 = vpop.f32.mrb[11].mxu1  ;;  %v403_v12 = vadd.f32 %v1198_v44, %v1071_v7 }
 0x2ce   :  { %v398_v11 = vadd.f32 %v1071_v7, %v397_v45  ;;  %v1507_v45 = vmov 0.0|0.0  }
 0x2cf   :  { %1322 = vmatprep.subr.bf16.mxu1 %v1507_v45  ;;  %1334 = vmatprep.subr.bf16.mxu0 %v1507_v45 }
 0x2d1   :  { %v1209_v46 = vpop.f32.mrb[0].mxu0 }
 0x2d2   :  { %v508_v47 = vpop.f32.mrb[1].mxu0 }
 0x2d3   :  { %1217 = vmatprep.mubr.msk.f32.mxu1 %vm198_vm1, %v508_v47  ;;  %v926_v47 = vld [vmem:[#allocation8] sm:$0xff] }
 0x2d4   :  { %1218 = vmatmul.mubr.msk.f32.vlgmr.msra.gmra.mrb[12].mxu1 %vm198_vm1, %v1209_v46  ;;  %v1509_v46 = vmov 0.0  }
 0x2d5   :  { %v1212_v48 = vpop.f32.mrb[2].mxu0 }
 0x2d6   :  { %v518_v49 = vpop.f32.mrb[3].mxu0 }
 0x2d7   :  { %1220 = vmatprep.mubr.msk.f32.mxu1 %vm198_vm1, %v518_v49  ;;  %v928_v49 = vld [vmem:[#allocation8 + $0x10] sm:$0xff] }
 0x2d8   :  { %1221 = vmatmul.mubr.msk.f32.gmra.mrb[14].mxu1 %vm198_vm1, %v1212_v48  ;;  %v927_v48 = vld [vmem:[#allocation8 + $0x8] sm:$0xff] }
 0x2d9   :  { %1241 = vmatprep.mubr.msk.f32.mxu1 %vm1508_vm2, %v1509_v46 }
 0x3a7   :  { %v1219_v51 = vpop.f32.mrb[12].mxu1 }
 0x3a8   :  { %v622_v52 = vadd.f32 %v1219_v51, %v1080_v50  ;;  %v616_v53 = vpop.f32.mrb[13].mxu1  ;;  %v929_v51 = vld [vmem:[#allocation8 + $0x18] sm:$0xff] }
 0x3a9   :  { %v617_v54 = vadd.f32 %v1080_v50, %v616_v53  ;;  %v930_v53 = vld [vmem:[#allocation8 + $0x20] sm:$0xff] }
 0x3aa   :  { %v636_v57 = vmax.f32 %v622_v52, 0.0  ;;  %v1338_v52 = vpack.c.bf16 %v929_v51, %v928_v49 }
 0x3ab   :  { %v635_v55 = vmax.f32 %v617_v54, 0.0  ;;  %v1222_v56 = vpop.f32.mrb[14].mxu1  ;;  %v931_v54 = vld [vmem:[#allocation8 + $0x28] sm:$0xff] }
 0x3ac   :  { %v632_v58 = vadd.f32 %v1222_v56, %v1080_v50  ;;  %v626_v59 = vpop.f32.mrb[15].mxu1  ;;  %v932_v56 = vld [vmem:[#allocation8 + $0x30] sm:$0xff] }
 0x3ad   :  { %v627_v60 = vadd.f32 %v1080_v50, %v626_v59  ;;  %1227 = vmatprep.mubr.msk.f32.mxu0 %vm198_vm1, %v635_v55  ;;  %v1335_v50 = vpack.c.bf16 %v927_v48, %v926_v47  ;;  %v1341_v55 = vpack.c.bf16 %v931_v54, %v930_v53  ;;  %v934_v59 = vld [vmem:[#allocation8 + $0x40] sm:$0xff]  ;;  %v1097_v47 = vld [vmem:[#allocation2] ss:$0 sm:$0xff] }
 0x3ae   :  { %1228 = vmatmul.mubr.msk.f32.vlgmr.msra.gmra.mrb[4].mxu0 %vm198_vm1, %v636_v57  ;;  %v638_v62 = vmax.f32 %v632_v58, 0.0  ;;  %v933_v57 = vld [vmem:[#allocation8 + $0x38] sm:$0xff] }
 0x3af   :  { %v637_v61 = vmax.f32 %v627_v60, 0.0  ;;  %1336 = vmatpush3.bf16.msra.mxu0 %v1335_v50  ;;  %v1344_v58 = vpack.c.bf16 %v933_v57, %v932_v56  ;;  %v935_v60 = vld [vmem:[#allocation8 + $0x48] sm:$0xff] }
 0x3b0   :  { %1337 = vmatprep.subr.bf16.mxu0 %v1507_v45 }
 0x3b1   :  { %1230 = vmatprep.mubr.msk.f32.mxu0 %vm198_vm1, %v637_v61  ;;  %v1347_v61 = vpack.c.bf16 %v935_v60, %v934_v59 }
 0x3b2   :  { %1231 = vmatmul.mubr.msk.f32.gmra.mrb[6].mxu0 %vm198_vm1, %v638_v62  ;;  %v936_v62 = vld [vmem:[#allocation8 + $0x50] sm:$0xff] }
 0x3b3   :  { %1287 = vmatprep.mubr.msk.f32.mxu0 %vm1508_vm2, %v1509_v46  ;;  %1339 = vmatpush3.bf16.msra.mxu0 %v1338_v52 }
 0x3b4   :  { %1340 = vmatprep.subr.bf16.mxu0 %v1507_v45 }
 0x3b7   :  { %1342 = vmatpush3.bf16.msra.mxu0 %v1341_v55 }
 0x3b8   :  { %1343 = vmatprep.subr.bf16.mxu0 %v1507_v45 }
 0x3bb   :  { %1345 = vmatpush3.bf16.msra.mxu0 %v1344_v58 }
 0x3bc   :  { %1346 = vmatprep.subr.bf16.mxu0 %v1507_v45 }
 0x3bf   :  { %1348 = vmatpush3.bf16.msra.mxu0 %v1347_v61 }
 0x3c0   :  { %1349 = vmatprep.subr.bf16.mxu0 %v1507_v45 }
 0x481   :  { %v1229_v0 = vpop.f32.mrb[4].mxu0 }
 0x482   :  { %v728_v1 = vpop.f32.mrb[5].mxu0  ;;  %v734_v6 = vadd.f32 %v1229_v0, %v1088_v63 }
 0x483   :  { %v729_v2 = vadd.f32 %v1088_v63, %v728_v1  ;;  %v938_v1 = vld [vmem:[#allocation8 + $0x60] sm:$0xff] }
 0x485   :  { %v1232_v3 = vpop.f32.mrb[6].mxu0  ;;  %747 = vmax.xlane.f32.xlu0 %v729_v2 }
 0x486   :  { %v744_v4 = vadd.f32 %v1232_v3, %v1088_v63  ;;  %v738_v5 = vpop.f32.mrb[7].mxu0 }
 0x487   :  { %v739_v8 = vadd.f32 %v1088_v63, %v738_v5  ;;  %v937_v63 = vld [vmem:[#allocation8 + $0x58] sm:$0xff] }
 0x488   :  { %753 = vmax.xlane.f32.xlu1 %v744_v4  ;;  %v1350_v0 = vpack.c.bf16 %v937_v63, %v936_v62  ;;  %v941_v5 = vld [vmem:[#allocation8 + $0x78] sm:$0xff] }
 0x489   :  { %749 = vmax.xlane.f32.xlu0 %v734_v6 }
 0x48a   :  { %1351 = vmatpush3.bf16.msra.mxu0 %v1350_v0 }
 0x48b   :  { %1352 = vmatprep.subr.bf16.mxu0 %v1507_v45 }
 0x48c   :  { %751 = vmax.xlane.f32.xlu1 %v739_v8 }
 0x48d   :  { %406 = vmax.xlane.f32.xlu0 %v388_v9 }
 0x490   :  { %408 = vmax.xlane.f32.xlu1 %v393_v10 }
 0x491   :  { %410 = vmax.xlane.f32.xlu0 %v398_v11 }
 0x494   :  { %412 = vmax.xlane.f32.xlu1 %v403_v12 }
 0x512   :  { %v748_v13 = vpop.xlane.xlu0 %747 }
 0x513   :  { %v755_v14 = vsub.f32 %v729_v2, %v748_v13  ;;  %v939_v2 = vld [vmem:[#allocation8 + $0x68] sm:$0xff] }
 0x514   :  { %v1353_v3 = vpack.c.bf16 %v939_v2, %v938_v1 }
 0x515   :  { %v759_v15 = vmul.f32 1.442695, %v755_v14  ;;  %v754_v16 = vpop.xlane.xlu1 %753 }
 0x516   :  { %v750_v17 = vpop.xlane.xlu0 %749  ;;  %v758_v18 = vsub.f32 %v744_v4, %v754_v16  ;;  %v940_v4 = vld [vmem:[#allocation8 + $0x70] sm:$0xff]  ;;  %1354 = vmatpush3.bf16.msra.mxu0 %v1353_v3 }
 0x517   :  { %1374 = vpow2.f32 %v759_v15  ;;  %v756_v19 = vsub.f32 %v734_v6, %v750_v17  ;;  %v1356_v6 = vpack.c.bf16 %v941_v5, %v940_v4  ;;  %1355 = vmatprep.subr.bf16.mxu0 %v1507_v45 }
 0x518   :  { %v765_v24 = vmul.f32 1.442695, %v758_v18 }
 0x519   :  { %v761_v20 = vmul.f32 1.442695, %v756_v19  ;;  %v752_v21 = vpop.xlane.xlu1 %751 }
 0x51a   :  { %v757_v22 = vsub.f32 %v739_v8, %v752_v21  ;;  %v407_v23 = vpop.xlane.xlu0 %406  ;;  %1357 = vmatpush3.bf16.msra.mxu0 %v1356_v6 }
 0x51b   :  { %1376 = vpow2.f32 %v761_v20  ;;  %v414_v25 = vsub.f32 %v388_v9, %v407_v23 }
 0x51c   :  { %v763_v26 = vmul.f32 1.442695, %v757_v22 }
 0x51d   :  { %v418_v27 = vmul.f32 1.442695, %v414_v25  ;;  %v409_v28 = vpop.xlane.xlu1 %408 }
 0x51e   :  { %1378 = vpow2.f32 %v763_v26  ;;  %v415_v29 = vsub.f32 %v393_v10, %v409_v28  ;;  %v411_v30 = vpop.xlane.xlu0 %410  ;;  %v90_v28 = vld [vmem:[%s1752_s2] sm:$0x3] }
 0x51f   :  { %1380 = vpow2.f32 %v765_v24  ;;  %v416_v31 = vsub.f32 %v398_v11, %v411_v30 }
 0x520   :  { %v420_v32 = vmul.f32 1.442695, %v415_v29  ;;  %1382 = vpow2.f32 %v418_v27 }
 0x521   :  { %v1677_v33 = vpop.eup %1374  ;;  %v422_v34 = vmul.f32 1.442695, %v416_v31  ;;  %v413_v35 = vpop.xlane.xlu1 %412 }
 0x522   :  { %1384 = vpow2.f32 %v420_v32  ;;  %v417_v36 = vsub.f32 %v403_v12, %v413_v35  ;;  %767 = vadd.xlane.f32.xlu0 %v1677_v33 }
 0x523   :  { %1386 = vpow2.f32 %v422_v34 }
 0x524   :  { %v424_v37 = vmul.f32 1.442695, %v417_v36 }
 0x525   :  { %v1680_v38 = vpop.eup %1376 }
 0x526   :  { %1388 = vpow2.f32 %v424_v37  ;;  %769 = vadd.xlane.f32.xlu1 %v1680_v38 }
 0x528   :  { %v1683_v39 = vpop.eup %1378 }
 0x529   :  { %v1685_v40 = vpop.eup %1380  ;;  %771 = vadd.xlane.f32.xlu0 %v1683_v39 }
 0x52a   :  { %773 = vadd.xlane.f32.xlu1 %v1685_v40  ;;  %v1689_v41 = vpop.eup %1382 }
 0x52c   :  { %v1691_v42 = vpop.eup %1384 }
 0x52d   :  { %426 = vadd.xlane.f32.xlu0 %v1689_v41  ;;  %v1695_v43 = vpop.eup %1386 }
 0x52e   :  { %428 = vadd.xlane.f32.xlu1 %v1691_v42 }
 0x530   :  { %v1697_v44 = vpop.eup %1388 }
 0x531   :  { %430 = vadd.xlane.f32.xlu0 %v1695_v43 }
 0x532   :  { %432 = vadd.xlane.f32.xlu1 %v1697_v44 }
 0x5af   :  { %v768_v7 = vpop.xlane.xlu0 %767 }
 0x5b0   :  { %1390 = vrcp.f32 %v768_v7 }
 0x5b3   :  { %v770_v8 = vpop.xlane.xlu1 %769 }
 0x5b4   :  { %1392 = vrcp.f32 %v770_v8 }
 0x5b6   :  { %v772_v9 = vpop.xlane.xlu0 %771 }
 0x5b7   :  { %1394 = vrcp.f32 %v772_v9  ;;  %v774_v10 = vpop.xlane.xlu1 %773 }
 0x5b8   :  { %1396 = vrcp.f32 %v774_v10 }
 0x5ba   :  { %v427_v11 = vpop.xlane.xlu0 %426  ;;  %v1391_v13 = vpop.eup %1390 }
 0x5bb   :  { %1398 = vrcp.f32 %v427_v11  ;;  %v429_v12 = vpop.xlane.xlu1 %428  ;;  %v776_v17 = vmul.f32 %v1391_v13, %v1677_v33 }
 0x5bc   :  { %1400 = vrcp.f32 %v429_v12 }
 0x5be   :  { %v1393_v14 = vpop.eup %1392  ;;  %v431_v15 = vpop.xlane.xlu0 %430 }
 0x5bf   :  { %1402 = vrcp.f32 %v431_v15  ;;  %v433_v16 = vpop.xlane.xlu1 %432  ;;  %v778_v18 = vmul.f32 %v1393_v14, %v1680_v38  ;;  %v1095_v38 = vld [vmem:[%s1758_s8] ss:$0 sm:$0xff]  ;;  %s1511_s8 = smov [#allocation9]  }
 0x5c0   :  { %1404 = vrcp.f32 %v433_v16  ;;  %s1052_s24 = sshll.u32 %s1511_s8, 4  ;;  %s1053_s24 = int_to_ptr.vmem [resolvable:$true] %s1052_s24 }
 0x5c1   :  { %v1395_v19 = vpop.eup %1394  ;;  %v1323_v20 = vpack.c.bf16 %v778_v18, %v776_v17  ;;  %s1472_s7 = scalar_lea.vmem %s1053_s24, 32  ;;  %p1477_p11 = scmp.lt.s32.totalorder %s1053_s24, %s1053_s24 }
 0x5c2   :  { %v1397_v21 = vpop.eup %1396  ;;  %v780_v22 = vmul.f32 %v1395_v19, %v1683_v39  ;;  %p1473_p10 = scmp.ne.s32.totalorder %s1053_s24, %s1472_s7  ;;  %p1478_p12 = scmp.lt.s32.totalorder %s1472_s7, %s1472_s7 }
 0x5c3   :  { %1324 = vmatpush3.bf16.msra.mxu1 %v1323_v20  ;;  %v782_v23 = vmul.f32 %v1397_v21, %v1685_v40 }
 0x5c4   :  { %1325 = vmatprep.subr.bf16.mxu1 %v1507_v45  ;;  %p1479_p13 = por %p1478_p12, %p1477_p11 }
 0x5c5   :  { %v1399_v24 = vpop.eup %1398  ;;  %v1326_v25 = vpack.c.bf16 %v782_v23, %v780_v22 }
 0x5c6   :  { %v1401_v26 = vpop.eup %1400  ;;  %v435_v27 = vmul.f32 %v1399_v24, %v1689_v41  ;;  %p1480_p0 = pnand %p1479_p13, %p1473_p10 }
 0x5c7   :  { %1327 = vmatpush3.bf16.msra.mxu1 %v1326_v25  ;;  %v437_v29 = vmul.f32 %v1401_v26, %v1691_v42  ;;  %v1096_v42 = vld [vmem:[%s1759_s9] ss:$0 sm:$0xff] }
 0x5c8   :  { %1328 = vmatprep.subr.bf16.mxu1 %v1507_v45 }
 0x5c9   :  { %v1403_v30 = vpop.eup %1402  ;;  %v1329_v31 = vpack.c.bf16 %v437_v29, %v435_v27 }
 0x5ca   :  { %v1405_v32 = vpop.eup %1404  ;;  %1242 = vmatmul.mubr.msk.f32.vlgmr.msra.gmra.mrb[16].mxu1 %vm91_vm0, %v90_v28  ;;  %v439_v33 = vmul.f32 %v1403_v30, %v1695_v43 }
 0x5cb   :  { %1330 = vmatpush3.bf16.msra.mxu1 %v1329_v31  ;;  %v441_v34 = vmul.f32 %v1405_v32, %v1697_v44  ;;  %1252 = vmatprep.mubr.msk.f32.mxu1 %vm1508_vm2, %v1509_v46  ;;  %v1510_v46 = vmov 0  }
 0x5cc   :  { %1331 = vmatprep.subr.bf16.mxu1 %v1507_v45  ;;  %1372 = vset.pattern.permute.xlu1 %v1510_v46 }
 0x5cd   :  { %v1332_v35 = vpack.c.bf16 %v441_v34, %v439_v33  ;;  %1373 = vset.pattern.permute.xlu0 %v1510_v46 }
 0x5cf   :  { %1333 = vmatpush3.bf16.msra.mxu1 %v1332_v35 }
 0x5d2   :  { %1253 = vmatmul.mubr.msk.f32.vlgmr.msra.gmra.mrb[16].mxu1 %vm91_vm0, %v90_v28 }
 0x6a5   :  { %v922_v36 = vpop.f32.mrb[16].mxu1 }
 0x6a6   :  { %v1254_v37 = vpop.f32.mrb[17].mxu1  ;;  %1288 = vmatmul.mubr.f32.vlgmr.msra.gmra.mrb[8].mxu0 %v922_v36 }
 0x779   :  { %v1015_v39 = vpop.f32.mrb[8].mxu0 }
 0x77a   :  { %v1016_v40 = vadd.f32 %v1095_v38, %v1015_v39  ;;  %v1289_v41 = vpop.f32.mrb[9].mxu0 }
 0x77c   :  { %v1019_v43 = vmax.f32 %v1016_v40, 0.0 }
 0x77e   :  { %v1027_v44 = vmul.f32 %v1096_v42, %v1019_v43 }
 0x780   :  { %v1029_v45 = vsel %vm1028_vm3, %v1027_v44, 0.0 }
 0x781   :  { %1030 = vadd.xlane.f32.xlu0 %v1029_v45 }
 0x80e   :  { %v1031_v48 = vpop.xlane.xlu0 %1030 }
 0x80f   :  { %v1039_v49 = vadd.f32 %v1097_v47, %v1031_v48 }
 0x811   :  { %1042 = vperm.xlu1 %1372, %v1039_v49  }
 0x890   :  { %v1043_v50 = vpop.permute.xlu1 %1042 }
 0x891   :  { %1045 = vst [vmem:[#allocation9] sm:$0x3] %v1043_v50 }
 0x892   :  { %1483 = shalt.err (!%p1480_p0)
}
 0x893   :  { %s1484_s20 = scalar_lea.hbm %s1761_s11, 32 }
 0x894   :  { %p1485_p1 = scmp.ne.s32.totalorder %s1761_s11, %s1484_s20  ;;  %p1488_p2 = scmp.lt.u32.totalorder %s1484_s20, %s1761_s11 }
 0x896   :  { %p1490_p3 = pnand %p1488_p2, %p1485_p1 }
 0x898   :  { %1493 = shalt.err (!%p1490_p3)
}
 0x899   :  { %1055 = dma.vmem_to_hbm [thread:$0]  %s1053_s24, 32, %s1761_s11, [#allocation5]  }
 0x89a   :  { %1498 = dma.done.wait [#allocation5], 32  }
 0x89b   :  { %1499 = vsyncadd [#allocation5], 4294967264 }
 0x89c   :  { %1059 = vsyncpa [#allocation4], 1 }
 0x89d   :  { %1060 = vsyncpa [#allocation7], 1 }
 0x89e   :  { %1061 = vsyncpa [#allocation5], 1 }

</bundles_post_ra>
